<compile_context>
chip_gen: v5e
topology: v5e:2x2
jax: 0.10.0
libtpu: 0.0.40
codegen_flags: <defaults>
</compile_context>

<pallas_src>
import numpy as np
import jax
import jax.numpy as jnp
from jax.experimental import pallas as pl
from jax.experimental.pallas import tpu as pltpu

# ---------------------------------------------------------------------------
# problem sizes (small, consistent with the module's forward semantics)
B = 16    # batch
T = 4     # theta (simulator parameter) dim
DX = 64   # observation dim
E = 32    # embedding dim
H = 32    # hidden dim

NORM_LOG_JACOBIAN = 1.25  # the `normalization_log_jacobian` float


def npe_with_embedding_kernel(
    theta_ref, x_ref,
    t_mu_ref, t_rsig_ref, x_mu_ref, x_rsig_ref,
    we1_ref, be1_ref, we2_ref, be2_ref,
    wt_ref, wc_ref, b1_ref, w2_ref, b2_ref,
    out_ref,
):
    # ---- normalize observations / parameters (f32 elementwise, VPU) ----
    # reciprocal sigmas are precomputed -> broadcast multiply, no divides.
    xn = (x_ref[...] - x_mu_ref[...]) * x_rsig_ref[...]          # (TB, DX) f32
    thn = (theta_ref[...] - t_mu_ref[...]) * t_rsig_ref[...]     # (TB, T)  f32

    # ---- embedding MLP: Dx -> H -> E (bf16 MXU operands, f32 accumulation) ----
    h1 = jnp.dot(xn.astype(jnp.bfloat16), we1_ref[...],
                 preferred_element_type=jnp.float32) + be1_ref[...]
    h1 = jnp.maximum(h1, 0.0)                                     # ReLU (f32 VPU)
    emb = jnp.dot(h1.astype(jnp.bfloat16), we2_ref[...],
                  preferred_element_type=jnp.float32) + be2_ref[...]

    # ---- NPE head on concat([theta_n, emb]) (concat folded into 2 matmuls) ----
    h2 = (jnp.dot(thn.astype(jnp.bfloat16), wt_ref[...],
                  preferred_element_type=jnp.float32)
          + jnp.dot(emb.astype(jnp.bfloat16), wc_ref[...],
                    preferred_element_type=jnp.float32)
          + b1_ref[...])
    h2 = jnp.maximum(h2, 0.0)                                     # ReLU (f32 VPU)

    # ---- final H -> 1 projection: VPU multiply + XLU lane-reduce (no MXU) ----
    logp = jnp.sum(h2 * w2_ref[...], axis=-1, keepdims=True) + b2_ref[...]

    # ---- add normalization log-Jacobian ----
    out_ref[...] = logp + NORM_LOG_JACOBIAN                       # (TB, 1)


def npe_with_embedding_forward(theta, x, params, *, tb=None):
    """Returns the posterior log probabilities, shape (B,)."""
    (t_mu, t_rsig, x_mu, x_rsig,
     we1, be1, we2, be2,
     wt, wc, b1, w2, b2) = params

    batch = theta.shape[0]
    if tb is None:
        # single grid step for small batches; >=512-row tiles at scale
        tb = batch if batch <= 512 else 512
    assert batch % tb == 0, "batch must be divisible by the batch tile"

    full = lambda shape: pl.BlockSpec(shape, lambda i: tuple(0 for _ in shape))

    out = pl.pallas_call(
        npe_with_embedding_kernel,
        out_shape=jax.ShapeDtypeStruct((batch, 1), jnp.float32),
        grid_spec=pltpu.PrefetchScalarGridSpec(
            num_scalar_prefetch=0,
            grid=(batch // tb,),
            in_specs=[
                pl.BlockSpec((tb, T), lambda i: (i, 0)),    # theta
                pl.BlockSpec((tb, DX), lambda i: (i, 0)),   # x
                full((1, T)), full((1, T)),                 # theta mu / 1/sigma
                full((1, DX)), full((1, DX)),               # x mu / 1/sigma
                full((DX, H)), full((1, H)),                # embedding layer 1
                full((H, E)), full((1, E)),                 # embedding layer 2
                full((T, H)), full((E, H)), full((1, H)),   # npe layer 1 (split concat)
                full((1, H)), full((1, 1)),                 # npe layer 2 (row-vector w2)
            ],
            out_specs=pl.BlockSpec((tb, 1), lambda i: (i, 0)),
        ),
        compiler_params=pltpu.CompilerParams(
            # parallel batch axis: shards across v7x's 2 TCs when grid > 1
            dimension_semantics=("parallel",)),
    )(theta, x, t_mu, t_rsig, x_mu, x_rsig,
      we1, be1, we2, be2, wt, wc, b1, w2, b2)
    return out[:, 0]


def make_params(key):
    ks = jax.random.split(key, 13)
    scale = 0.1
    t_mu = jax.random.normal(ks[0], (1, T), jnp.float32)
    t_sig = 1.0 + 0.5 * jax.nn.sigmoid(jax.random.normal(ks[1], (1, T), jnp.float32))
    x_mu = jax.random.normal(ks[2], (1, DX), jnp.float32)
    x_sig = 1.0 + 0.5 * jax.nn.sigmoid(jax.random.normal(ks[3], (1, DX), jnp.float32))
    # reciprocals computed ONCE outside the kernel (divide -> multiply in-kernel)
    t_rsig = 1.0 / t_sig
    x_rsig = 1.0 / x_sig
    # matmul weights stored/fed as bf16 (MXU-native on v6e/v7x, halves HBM bytes);
    # biases and the final row-projection stay f32 (pure VPU/XLU work).
    we1 = (scale * jax.random.normal(ks[4], (DX, H), jnp.float32)).astype(jnp.bfloat16)
    be1 = scale * jax.random.normal(ks[5], (1, H), jnp.float32)
    we2 = (scale * jax.random.normal(ks[6], (H, E), jnp.float32)).astype(jnp.bfloat16)
    be2 = scale * jax.random.normal(ks[7], (1, E), jnp.float32)
    wt = (scale * jax.random.normal(ks[8], (T, H), jnp.float32)).astype(jnp.bfloat16)
    wc = (scale * jax.random.normal(ks[9], (E, H), jnp.float32)).astype(jnp.bfloat16)
    b1 = scale * jax.random.normal(ks[10], (1, H), jnp.float32)
    w2 = scale * jax.random.normal(ks[11], (1, H), jnp.float32)   # row vector
    b2 = scale * jax.random.normal(ks[12], (1, 1), jnp.float32)
    return (t_mu, t_rsig, x_mu, x_rsig, we1, be1, we2, be2, wt, wc, b1, w2, b2)


def reference_forward(theta, x, params):
    """Pure-JAX reference mirroring the kernel's mixed-precision math."""
    (t_mu, t_rsig, x_mu, x_rsig, we1, be1, we2, be2, wt, wc, b1, w2, b2) = params
    xn = (x - x_mu) * x_rsig
    thn = (theta - t_mu) * t_rsig
    h1 = jnp.maximum(
        jnp.dot(xn.astype(jnp.bfloat16), we1, preferred_element_type=jnp.float32) + be1, 0.0)
    emb = jnp.dot(h1.astype(jnp.bfloat16), we2, preferred_element_type=jnp.float32) + be2
    h2 = jnp.maximum(
        jnp.dot(thn.astype(jnp.bfloat16), wt, preferred_element_type=jnp.float32)
        + jnp.dot(emb.astype(jnp.bfloat16), wc, preferred_element_type=jnp.float32)
        + b1, 0.0)
    logp = jnp.sum(h2 * w2, axis=-1, keepdims=True) + b2
    return (logp + NORM_LOG_JACOBIAN)[:, 0]


def reference_forward_f32(theta, x, params):
    """Full-f32 reference (sanity check only; bf16 MXU operands drift slightly)."""
    (t_mu, t_rsig, x_mu, x_rsig, we1, be1, we2, be2, wt, wc, b1, w2, b2) = params
    xn = (x - x_mu) * x_rsig
    thn = (theta - t_mu) * t_rsig
    h1 = jnp.maximum(xn @ we1.astype(jnp.float32) + be1, 0.0)
    emb = h1 @ we2.astype(jnp.float32) + be2
    h2 = jnp.maximum(thn @ wt.astype(jnp.float32) + emb @ wc.astype(jnp.float32) + b1, 0.0)
    logp = jnp.sum(h2 * w2, axis=-1, keepdims=True) + b2
    return (logp + NORM_LOG_JACOBIAN)[:, 0]


if __name__ == "__main__":
    key = jax.random.PRNGKey(0)
    k_theta, k_x, k_params = jax.random.split(key, 3)

    theta = jax.random.normal(k_theta, (B, T), jnp.float32)
    x = jax.random.normal(k_x, (B, DX), jnp.float32)
    params = make_params(k_params)

    out = npe_with_embedding_forward(theta, x, params)
    out = jax.block_until_ready(out)
    assert out.shape == (B,)

    # tight check against a reference doing the exact same mixed-precision math
    ref = jax.block_until_ready(reference_forward(theta, x, params))
    np.testing.assert_allclose(np.asarray(out), np.asarray(ref), rtol=1e-3, atol=1e-3)

    # loose sanity check against pure-f32 math (bounds the bf16-MXU drift)
    ref32 = jax.block_until_ready(reference_forward_f32(theta, x, params))
    np.testing.assert_allclose(np.asarray(out), np.asarray(ref32), rtol=5e-2, atol=5e-2)

    print("KERNEL_OK")
</pallas_src>

<mosaic_0001>
module attributes {stable_mosaic.version = 11 : i64} {
  func.func @npe_with_embedding_kernel(%arg0: i32, %arg1: memref<16x4xf32, #tpu.memory_space<vmem>>, %arg2: memref<16x64xf32, #tpu.memory_space<vmem>>, %arg3: memref<1x4xf32, #tpu.memory_space<vmem>>, %arg4: memref<1x4xf32, #tpu.memory_space<vmem>>, %arg5: memref<1x64xf32, #tpu.memory_space<vmem>>, %arg6: memref<1x64xf32, #tpu.memory_space<vmem>>, %arg7: memref<64x32xbf16, #tpu.memory_space<vmem>>, %arg8: memref<1x32xf32, #tpu.memory_space<vmem>>, %arg9: memref<32x32xbf16, #tpu.memory_space<vmem>>, %arg10: memref<1x32xf32, #tpu.memory_space<vmem>>, %arg11: memref<4x32xbf16, #tpu.memory_space<vmem>>, %arg12: memref<32x32xbf16, #tpu.memory_space<vmem>>, %arg13: memref<1x32xf32, #tpu.memory_space<vmem>>, %arg14: memref<1x32xf32, #tpu.memory_space<vmem>>, %arg15: memref<1x1xf32, #tpu.memory_space<vmem>>, %arg16: memref<16x1xf32, #tpu.memory_space<vmem>>) attributes {dimension_semantics = [#tpu.dimension_semantics<parallel>], iteration_bounds = array<i64: 1>, scalar_prefetch = 0 : i64, scratch_operands = 0 : i64, tpu.core_type = #tpu.core_type<tc>, window_params = [{transform_indices = @transform_0, window_bounds = array<i64: 16, 4>}, {transform_indices = @transform_1, window_bounds = array<i64: 16, 64>}, {pipeline_mode = #tpu.pipeline_mode<synchronous>, transform_indices = @transform_2, window_bounds = array<i64: 1, 4>}, {pipeline_mode = #tpu.pipeline_mode<synchronous>, transform_indices = @transform_3, window_bounds = array<i64: 1, 4>}, {pipeline_mode = #tpu.pipeline_mode<synchronous>, transform_indices = @transform_4, window_bounds = array<i64: 1, 64>}, {pipeline_mode = #tpu.pipeline_mode<synchronous>, transform_indices = @transform_5, window_bounds = array<i64: 1, 64>}, {pipeline_mode = #tpu.pipeline_mode<synchronous>, transform_indices = @transform_6, window_bounds = array<i64: 64, 32>}, {pipeline_mode = #tpu.pipeline_mode<synchronous>, transform_indices = @transform_7, window_bounds = array<i64: 1, 32>}, {pipeline_mode = #tpu.pipeline_mode<synchronous>, transform_indices = @transform_8, window_bounds = array<i64: 32, 32>}, {pipeline_mode = #tpu.pipeline_mode<synchronous>, transform_indices = @transform_9, window_bounds = array<i64: 1, 32>}, {pipeline_mode = #tpu.pipeline_mode<synchronous>, transform_indices = @transform_10, window_bounds = array<i64: 4, 32>}, {pipeline_mode = #tpu.pipeline_mode<synchronous>, transform_indices = @transform_11, window_bounds = array<i64: 32, 32>}, {pipeline_mode = #tpu.pipeline_mode<synchronous>, transform_indices = @transform_12, window_bounds = array<i64: 1, 32>}, {pipeline_mode = #tpu.pipeline_mode<synchronous>, transform_indices = @transform_13, window_bounds = array<i64: 1, 32>}, {pipeline_mode = #tpu.pipeline_mode<synchronous>, transform_indices = @transform_14, window_bounds = array<i64: 1, 1>}, {transform_indices = @transform_15, window_bounds = array<i64: 16, 1>}]} {
    %c0 = arith.constant 0 : index
    %c0_0 = arith.constant 0 : index
    %0 = vector.load %arg2[%c0, %c0_0] : memref<16x64xf32, #tpu.memory_space<vmem>>, vector<16x64xf32>
    %c0_1 = arith.constant 0 : index
    %c0_2 = arith.constant 0 : index
    %1 = vector.load %arg5[%c0_1, %c0_2] : memref<1x64xf32, #tpu.memory_space<vmem>>, vector<1x64xf32>
    %2 = vector.broadcast %1 : vector<1x64xf32> to vector<16x64xf32>
    %3 = arith.subf %0, %2 : vector<16x64xf32>
    %c0_3 = arith.constant 0 : index
    %c0_4 = arith.constant 0 : index
    %4 = vector.load %arg6[%c0_3, %c0_4] : memref<1x64xf32, #tpu.memory_space<vmem>>, vector<1x64xf32>
    %5 = vector.broadcast %4 : vector<1x64xf32> to vector<16x64xf32>
    %6 = arith.mulf %3, %5 : vector<16x64xf32>
    %c0_5 = arith.constant 0 : index
    %c0_6 = arith.constant 0 : index
    %7 = vector.load %arg1[%c0_5, %c0_6] : memref<16x4xf32, #tpu.memory_space<vmem>>, vector<16x4xf32>
    %c0_7 = arith.constant 0 : index
    %c0_8 = arith.constant 0 : index
    %8 = vector.load %arg3[%c0_7, %c0_8] : memref<1x4xf32, #tpu.memory_space<vmem>>, vector<1x4xf32>
    %9 = vector.broadcast %8 : vector<1x4xf32> to vector<16x4xf32>
    %10 = arith.subf %7, %9 : vector<16x4xf32>
    %c0_9 = arith.constant 0 : index
    %c0_10 = arith.constant 0 : index
    %11 = vector.load %arg4[%c0_9, %c0_10] : memref<1x4xf32, #tpu.memory_space<vmem>>, vector<1x4xf32>
    %12 = vector.broadcast %11 : vector<1x4xf32> to vector<16x4xf32>
    %13 = arith.mulf %10, %12 : vector<16x4xf32>
    %14 = arith.truncf %6 : vector<16x64xf32> to vector<16x64xbf16>
    %c0_11 = arith.constant 0 : index
    %c0_12 = arith.constant 0 : index
    %15 = vector.load %arg7[%c0_11, %c0_12] : memref<64x32xbf16, #tpu.memory_space<vmem>>, vector<64x32xbf16>
    %cst = arith.constant dense<0.000000e+00> : vector<16x32xf32>
    %16 = tpu.matmul %14, %15, %cst {dimension_numbers = #tpu.dot_dimension_numbers<[1], [0], [0], [1], [0, 0, 1, 1], [], []>} : vector<16x64xbf16>, vector<64x32xbf16>, vector<16x32xf32> -> vector<16x32xf32>
    %c0_13 = arith.constant 0 : index
    %c0_14 = arith.constant 0 : index
    %17 = vector.load %arg8[%c0_13, %c0_14] : memref<1x32xf32, #tpu.memory_space<vmem>>, vector<1x32xf32>
    %18 = vector.broadcast %17 : vector<1x32xf32> to vector<16x32xf32>
    %19 = arith.addf %16, %18 : vector<16x32xf32>
    %cst_15 = arith.constant 0.000000e+00 : f32
    %20 = vector.broadcast %cst_15 : f32 to vector<16x32xf32>
    %21 = arith.maximumf %19, %20 : vector<16x32xf32>
    %22 = arith.truncf %21 : vector<16x32xf32> to vector<16x32xbf16>
    %c0_16 = arith.constant 0 : index
    %c0_17 = arith.constant 0 : index
    %23 = vector.load %arg9[%c0_16, %c0_17] : memref<32x32xbf16, #tpu.memory_space<vmem>>, vector<32x32xbf16>
    %cst_18 = arith.constant dense<0.000000e+00> : vector<16x32xf32>
    %24 = tpu.matmul %22, %23, %cst_18 {dimension_numbers = #tpu.dot_dimension_numbers<[1], [0], [0], [1], [0, 0, 1, 1], [], []>} : vector<16x32xbf16>, vector<32x32xbf16>, vector<16x32xf32> -> vector<16x32xf32>
    %c0_19 = arith.constant 0 : index
    %c0_20 = arith.constant 0 : index
    %25 = vector.load %arg10[%c0_19, %c0_20] : memref<1x32xf32, #tpu.memory_space<vmem>>, vector<1x32xf32>
    %26 = vector.broadcast %25 : vector<1x32xf32> to vector<16x32xf32>
    %27 = arith.addf %24, %26 : vector<16x32xf32>
    %28 = arith.truncf %13 : vector<16x4xf32> to vector<16x4xbf16>
    %c0_21 = arith.constant 0 : index
    %c0_22 = arith.constant 0 : index
    %29 = vector.load %arg11[%c0_21, %c0_22] : memref<4x32xbf16, #tpu.memory_space<vmem>>, vector<4x32xbf16>
    %cst_23 = arith.constant dense<0.000000e+00> : vector<16x32xf32>
    %30 = tpu.matmul %28, %29, %cst_23 {dimension_numbers = #tpu.dot_dimension_numbers<[1], [0], [0], [1], [0, 0, 1, 1], [], []>} : vector<16x4xbf16>, vector<4x32xbf16>, vector<16x32xf32> -> vector<16x32xf32>
    %31 = arith.truncf %27 : vector<16x32xf32> to vector<16x32xbf16>
    %c0_24 = arith.constant 0 : index
    %c0_25 = arith.constant 0 : index
    %32 = vector.load %arg12[%c0_24, %c0_25] : memref<32x32xbf16, #tpu.memory_space<vmem>>, vector<32x32xbf16>
    %cst_26 = arith.constant dense<0.000000e+00> : vector<16x32xf32>
    %33 = tpu.matmul %31, %32, %cst_26 {dimension_numbers = #tpu.dot_dimension_numbers<[1], [0], [0], [1], [0, 0, 1, 1], [], []>} : vector<16x32xbf16>, vector<32x32xbf16>, vector<16x32xf32> -> vector<16x32xf32>
    %34 = arith.addf %30, %33 : vector<16x32xf32>
    %c0_27 = arith.constant 0 : index
    %c0_28 = arith.constant 0 : index
    %35 = vector.load %arg13[%c0_27, %c0_28] : memref<1x32xf32, #tpu.memory_space<vmem>>, vector<1x32xf32>
    %36 = vector.broadcast %35 : vector<1x32xf32> to vector<16x32xf32>
    %37 = arith.addf %34, %36 : vector<16x32xf32>
    %cst_29 = arith.constant 0.000000e+00 : f32
    %38 = vector.broadcast %cst_29 : f32 to vector<16x32xf32>
    %39 = arith.maximumf %37, %38 : vector<16x32xf32>
    %c0_30 = arith.constant 0 : index
    %c0_31 = arith.constant 0 : index
    %40 = vector.load %arg14[%c0_30, %c0_31] : memref<1x32xf32, #tpu.memory_space<vmem>>, vector<1x32xf32>
    %41 = vector.broadcast %40 : vector<1x32xf32> to vector<16x32xf32>
    %42 = arith.mulf %39, %41 : vector<16x32xf32>
    %cst_32 = arith.constant dense<0.000000e+00> : vector<16xf32>
    %43 = vector.multi_reduction <add>, %42, %cst_32 [1] : vector<16x32xf32> to vector<16xf32>
    %44 = vector.shape_cast %43 : vector<16xf32> to vector<16x1xf32>
    %c0_33 = arith.constant 0 : index
    %c0_34 = arith.constant 0 : index
    %45 = vector.load %arg15[%c0_33, %c0_34] : memref<1x1xf32, #tpu.memory_space<vmem>>, vector<1x1xf32>
    %46 = vector.broadcast %45 : vector<1x1xf32> to vector<16x1xf32>
    %47 = arith.addf %44, %46 : vector<16x1xf32>
    %cst_35 = arith.constant 1.250000e+00 : f32
    %48 = vector.broadcast %cst_35 : f32 to vector<16x1xf32>
    %49 = arith.addf %47, %48 : vector<16x1xf32>
    %c0_36 = arith.constant 0 : index
    %c0_37 = arith.constant 0 : index
    %50 = vector.load %arg16[%c0_36, %c0_37] : memref<16x1xf32, #tpu.memory_space<vmem>>, vector<16x1xf32>
    tpu.vector_store %arg16[%c0_36, %c0_37], %49 {strides = array<i32>} : memref<16x1xf32, #tpu.memory_space<vmem>>, vector<16x1xf32>,
    return
  }
  func.func @transform_0(%arg0: i32) -> (i32, i32) {
    %c0_i32 = arith.constant 0 : i32
    %c0_i32_0 = arith.constant 0 : i32
    return %arg0, %c0_i32 : i32, i32
  }
  func.func @transform_1(%arg0: i32) -> (i32, i32) {
    %c0_i32 = arith.constant 0 : i32
    %c0_i32_0 = arith.constant 0 : i32
    return %arg0, %c0_i32 : i32, i32
  }
  func.func @transform_2(%arg0: i32) -> (i32, i32) {
    %c0_i32 = arith.constant 0 : i32
    %c0_i32_0 = arith.constant 0 : i32
    %c0_i32_1 = arith.constant 0 : i32
    return %c0_i32, %c0_i32_0 : i32, i32
  }
  func.func @transform_3(%arg0: i32) -> (i32, i32) {
    %c0_i32 = arith.constant 0 : i32
    %c0_i32_0 = arith.constant 0 : i32
    %c0_i32_1 = arith.constant 0 : i32
    return %c0_i32, %c0_i32_0 : i32, i32
  }
  func.func @transform_4(%arg0: i32) -> (i32, i32) {
    %c0_i32 = arith.constant 0 : i32
    %c0_i32_0 = arith.constant 0 : i32
    %c0_i32_1 = arith.constant 0 : i32
    return %c0_i32, %c0_i32_0 : i32, i32
  }
  func.func @transform_5(%arg0: i32) -> (i32, i32) {
    %c0_i32 = arith.constant 0 : i32
    %c0_i32_0 = arith.constant 0 : i32
    %c0_i32_1 = arith.constant 0 : i32
    return %c0_i32, %c0_i32_0 : i32, i32
  }
  func.func @transform_6(%arg0: i32) -> (i32, i32) {
    %c0_i32 = arith.constant 0 : i32
    %c0_i32_0 = arith.constant 0 : i32
    %c0_i32_1 = arith.constant 0 : i32
    return %c0_i32, %c0_i32_0 : i32, i32
  }
  func.func @transform_7(%arg0: i32) -> (i32, i32) {
    %c0_i32 = arith.constant 0 : i32
    %c0_i32_0 = arith.constant 0 : i32
    %c0_i32_1 = arith.constant 0 : i32
    return %c0_i32, %c0_i32_0 : i32, i32
  }
  func.func @transform_8(%arg0: i32) -> (i32, i32) {
    %c0_i32 = arith.constant 0 : i32
    %c0_i32_0 = arith.constant 0 : i32
    %c0_i32_1 = arith.constant 0 : i32
    return %c0_i32, %c0_i32_0 : i32, i32
  }
  func.func @transform_9(%arg0: i32) -> (i32, i32) {
    %c0_i32 = arith.constant 0 : i32
    %c0_i32_0 = arith.constant 0 : i32
    %c0_i32_1 = arith.constant 0 : i32
    return %c0_i32, %c0_i32_0 : i32, i32
  }
  func.func @transform_10(%arg0: i32) -> (i32, i32) {
    %c0_i32 = arith.constant 0 : i32
    %c0_i32_0 = arith.constant 0 : i32
    %c0_i32_1 = arith.constant 0 : i32
    return %c0_i32, %c0_i32_0 : i32, i32
  }
  func.func @transform_11(%arg0: i32) -> (i32, i32) {
    %c0_i32 = arith.constant 0 : i32
    %c0_i32_0 = arith.constant 0 : i32
    %c0_i32_1 = arith.constant 0 : i32
    return %c0_i32, %c0_i32_0 : i32, i32
  }
  func.func @transform_12(%arg0: i32) -> (i32, i32) {
    %c0_i32 = arith.constant 0 : i32
    %c0_i32_0 = arith.constant 0 : i32
    %c0_i32_1 = arith.constant 0 : i32
    return %c0_i32, %c0_i32_0 : i32, i32
  }
  func.func @transform_13(%arg0: i32) -> (i32, i32) {
    %c0_i32 = arith.constant 0 : i32
    %c0_i32_0 = arith.constant 0 : i32
    %c0_i32_1 = arith.constant 0 : i32
    return %c0_i32, %c0_i32_0 : i32, i32
  }
  func.func @transform_14(%arg0: i32) -> (i32, i32) {
    %c0_i32 = arith.constant 0 : i32
    %c0_i32_0 = arith.constant 0 : i32
    %c0_i32_1 = arith.constant 0 : i32
    return %c0_i32, %c0_i32_0 : i32, i32
  }
  func.func @transform_15(%arg0: i32) -> (i32, i32) {
    %c0_i32 = arith.constant 0 : i32
    %c0_i32_0 = arith.constant 0 : i32
    return %arg0, %c0_i32 : i32, i32
  }
}

</mosaic_0001>

<bundles_post_ra>
// kernel: tpu_custom_call.1
= control target key start
LH: loop header
LB: loop body
LE: loop exit
PB: predicated region body
PF: predicated region fallthrough
CT: control target
= control target key end

     0   :  { %vm118_vm0 = vcmask 523264   ;;  %vm159_vm1 = vcmask 261120   ;;  %vm217_vm2 = vcmask 1041408   ;;  %vm213_vm3 = vcmask 31744   ;;  %s479_s6 = inlined_call_operand.vmem [shape: bf16[64,32], index: 6, kind: input, shape index: {}]   ;;  %s480_s1 = inlined_call_operand.vmem [shape: f32[16,64], index: 1, kind: input, shape index: {}]   ;;  %s481_s4 = inlined_call_operand.vmem [shape: f32[1,64], index: 4, kind: input, shape index: {}]   ;;  %s482_s5 = inlined_call_operand.vmem [shape: f32[1,64], index: 5, kind: input, shape index: {}]   ;;  %s483_s7 = inlined_call_operand.vmem [shape: f32[1,32], index: 7, kind: input, shape index: {}]   ;;  %s484_s9 = inlined_call_operand.vmem [shape: f32[1,32], index: 9, kind: input, shape index: {}]   ;;  %s485_s8 = inlined_call_operand.vmem [shape: bf16[32,32], index: 8, kind: input, shape index: {}]   ;;  %s486_s2 = inlined_call_operand.vmem [shape: f32[1,4], index: 2, kind: input, shape index: {}]   ;;  %s487_s3 = inlined_call_operand.vmem [shape: f32[1,4], index: 3, kind: input, shape index: {}]   ;;  %s488_s0 = inlined_call_operand.vmem [shape: f32[16,4], index: 0, kind: input, shape index: {}]   ;;  %s489_s10 = inlined_call_operand.vmem [shape: bf16[4,32], index: 10, kind: input, shape index: {}]   ;;  %s490_s11 = inlined_call_operand.vmem [shape: bf16[32,32], index: 11, kind: input, shape index: {}]   ;;  %s491_s12 = inlined_call_operand.vmem [shape: f32[1,32], index: 12, kind: input, shape index: {}]   ;;  %s492_s13 = inlined_call_operand.vmem [shape: f32[1,32], index: 13, kind: input, shape index: {}]   ;;  %s493_s14 = inlined_call_operand.<no memory space> [shape: f32[1,1], index: 14, kind: input, shape index: {}]   ;;  %s494_s15 = inlined_call_operand.vmem [shape: f32[16,1], index: 15, kind: output, shape index: {}]  }
   0x1   :  { %v309_v0 = vld [vmem:[%s479_s6 + $0x18] sm:$0xff]  ;;  %v308_v1 = vld [vmem:[%s479_s6 + $0x10] sm:$0xff]  ;;  %v53_v2 = vld [vmem:[%s480_s1] sm:$0xff]  ;;  %v20_v42 = vstv %s493_s14  ;;  %vm263_vm4 = vcmask 7168  }
   0x2   :  { %v54_v3 = vld [vmem:[%s480_s1 + $0x8] sm:$0xff]  ;;  %126 = vmatpush.bf16.msra.mxu0 %v309_v0  ;;  %v314_v4 = vld [vmem:[%s481_s4] ss:$0 sm:$0xff]  ;;  %21 = vst [vmem:[#allocation2] sm:$0x1] %v20_v42 }
   0x3   :  { %v59_v5 = vsub.f32 %v53_v2, %v314_v4  ;;  %v60_v6 = vsub.f32 %v54_v3, %v314_v4  ;;  %v315_v7 = vld [vmem:[%s482_s5] ss:$0 sm:$0xff]  ;;  %v307_v8 = vld [vmem:[%s479_s6 + $0x8] sm:$0xff] }
   0x4   :  { %v306_v11 = vld [vmem:[%s479_s6] sm:$0xff]  ;;  %v311_v13 = vld [vmem:[%s485_s8 + $0x8] sm:$0xff] }
   0x5   :  { %v65_v9 = vmul.f32 %v315_v7, %v59_v5  ;;  %v66_v10 = vmul.f32 %v315_v7, %v60_v6  ;;  %169 = vmatpush.bf16.msra.mxu1 %v311_v13  ;;  %v310_v14 = vld [vmem:[%s485_s8] sm:$0xff]  ;;  %v68_v25 = vld [vmem:[%s488_s0 + $0x8] sm:$0xff] }
   0x6   :  { %127 = vmatpush.bf16.msra.mxu0 %v308_v1  ;;  %v316_v16 = vld [vmem:[%s483_s7] ss:$0 sm:$0xff]  ;;  %v313_v33 = vld [vmem:[%s490_s11 + $0x8] sm:$0xff] }
   0x7   :  { %v81_v12 = vpack.c.bf16 %v66_v10, %v65_v9  ;;  %v318_v23 = vld [vmem:[%s486_s2] ss:$0 sm:$0xff]  ;;  %205 = vmatpush.bf16.msra.mxu2 %v313_v33 }
   0x8   :  { %v67_v24 = vld [vmem:[%s488_s0] sm:$0xff]  ;;  %v74_v27 = vsub.f32 %v68_v25, %v318_v23 }
   0x9   :  { %170 = vmatpush.bf16.msra.mxu1 %v310_v14  ;;  %v73_v26 = vsub.f32 %v67_v24, %v318_v23  ;;  %v319_v28 = vld [vmem:[%s487_s3] ss:$0 sm:$0xff] }
   0xa   :  { %128 = vmatpush.bf16.msra.mxu0 %v307_v8  ;;  %v178_v29 = vld [vmem:[%s489_s10] sm:$0x3]  ;;  %v80_v32 = vmul.f32 %v319_v28, %v74_v27 }
   0xb   :  { %v219_v30 = vsel %vm217_vm2, %v178_v29, 0  ;;  %v79_v31 = vmul.f32 %v319_v28, %v73_v26  ;;  %v312_v35 = vld [vmem:[%s490_s11] sm:$0xff] }
   0xc   :  { %228 = vmatpush.bf16.msra.mxu3 %v219_v30  ;;  %206 = vmatpush.bf16.msra.mxu2 %v312_v35  ;;  %v317_v37 = vld [vmem:[%s484_s9] ss:$0 sm:$0xff] }
   0xd   :  { %v177_v34 = vpack.c.bf16 %v80_v32, %v79_v31  ;;  %v320_v44 = vld [vmem:[%s491_s12] ss:$0 sm:$0xff] }
   0xe   :  { %129 = vmatpush.bf16.msra.mxu0 %v306_v11  ;;  %v321_v48 = vld [vmem:[%s492_s13] ss:$0 sm:$0xff] }
   0xf   :  { %305 = vmatmul.msk.bf16.vlgmr.msra.gmra.mxu3 %vm213_vm3, %v177_v34  ;;  %v322_v59 = vld [vmem:[#allocation2] ss:$0 sm:$0xff] }
  0x11   :  { %286 = vmatmul.msk.bf16.vlgmr.msra.gmra.mxu0 %vm118_vm0, %v81_v12 }
  0x8e   :  { %v131_v15 = vpop.f32.mrf.mxu0 }
  0x8f   :  { %v132_v17 = vadd.f32 %v316_v16, %v131_v15 }
  0x91   :  { %v136_v20 = vmax.f32 %v132_v17, 0.0 }
  0x92   :  { %v230_v43 = vpop.f32.mrf.mxu3 }
  0x96   :  { %v133_v18 = vpop.f32.mrf.mxu0 }
  0x97   :  { %v134_v19 = vadd.f32 %v316_v16, %v133_v18 }
  0x99   :  { %v137_v21 = vmax.f32 %v134_v19, 0.0 }
  0x9a   :  { %v232_v51 = vpop.f32.mrf.mxu3 }
  0x9b   :  { %v138_v22 = vpack.c.bf16 %v137_v21, %v136_v20 }
  0x9d   :  { %295 = vmatmul.msk.bf16.vlgmr.msra.gmra.mxu1 %vm159_vm1, %v138_v22 }
 0x11a   :  { %v172_v36 = vpop.f32.mrf.mxu1 }
 0x11b   :  { %v173_v39 = vadd.f32 %v317_v37, %v172_v36 }
 0x122   :  { %v174_v38 = vpop.f32.mrf.mxu1 }
 0x123   :  { %v175_v40 = vadd.f32 %v317_v37, %v174_v38 }
 0x125   :  { %v179_v41 = vpack.c.bf16 %v175_v40, %v173_v39 }
 0x127   :  { %304 = vmatmul.msk.bf16.vlgmr.msra.gmra.mxu2 %vm159_vm1, %v179_v41 }
 0x1aa   :  { %v208_v45 = vpop.f32.mrf.mxu2 }
 0x1ab   :  { %v231_v46 = vadd.f32 %v230_v43, %v208_v45 }
 0x1ad   :  { %v239_v47 = vadd.f32 %v320_v44, %v231_v46 }
 0x1af   :  { %v241_v49 = vmax.f32 %v239_v47, 0.0 }
 0x1b1   :  { %v247_v50 = vmul.f32 %v321_v48, %v241_v49 }
 0x1b2   :  { %v210_v52 = vpop.f32.mrf.mxu2 }
 0x1b3   :  { %v233_v53 = vadd.f32 %v232_v51, %v210_v52  ;;  %v249_v54 = vsel %vm159_vm1, %v247_v50, 0.0 }
 0x1b4   :  { %250 = vadd.xlane.f32.xlu0 %v249_v54 }
 0x1b5   :  { %v240_v55 = vadd.f32 %v320_v44, %v233_v53 }
 0x1b7   :  { %v242_v56 = vmax.f32 %v240_v55, 0.0 }
 0x1b9   :  { %v248_v57 = vmul.f32 %v321_v48, %v242_v56 }
 0x1bb   :  { %v252_v58 = vsel %vm159_vm1, %v248_v57, 0.0 }
 0x1bc   :  { %253 = vadd.xlane.f32.xlu0 %v252_v58 }
 0x227   :  { %v251_v60 = vpop.xlane.xlu0 %250 }
 0x228   :  { %v259_v61 = vadd.f32 %v322_v59, %v251_v60 }
 0x22a   :  { %v261_v62 = vadd.f32 1.25, %v259_v61 }
 0x22c   :  { %264 = vst.msk [vmem:[%s494_s15] sm:$0xff] %vm263_vm4, %v261_v62 }
 0x22f   :  { %v254_v63 = vpop.xlane.xlu0 %253 }
 0x230   :  { %v260_v0 = vadd.f32 %v322_v59, %v254_v63 }
 0x232   :  { %v262_v1 = vadd.f32 1.25, %v260_v0 }
 0x234   :  { %265 = vst.msk [vmem:[%s494_s15 + $0x8] sm:$0xff] %vm263_vm4, %v262_v1 }

</bundles_post_ra>
